<compile_context>
chip_gen: v7x
topology: tpu7x:2x2x1
jax: 0.10.0
libtpu: 0.0.40
codegen_flags: <defaults>
</compile_context>

<pallas_src>
import functools

import numpy as np
import jax
import jax.numpy as jnp
from jax import lax
from jax.experimental import pallas as pl
from jax.experimental.pallas import tpu as pltpu

EPS = 1e-12  # matches torch.nn.functional.normalize default eps


def netvlad_kernel(x_ref, w_ref, b_ref, cent_ref, out_ref, agg_ref, asum_ref,
                   *, compute_dtype, approx_recip):
    # x_ref:    (1, C, tS)  activation tile, spatial S on lanes
    # w_ref:    (K, C)      1x1-conv weight (already in compute_dtype)
    # b_ref:    (K, 1)      conv bias (f32)
    # cent_ref: (C, K)      cluster centroids, pre-transposed (f32)
    # out_ref:  (1, C, K)   VLAD descriptor in (C, K) layout
    # agg_ref:  (C, K)      VMEM accumulator: sum_s x[c,s] * a'[k,s]
    # asum_ref: (1, K)      VMEM accumulator: sum_s a[k,s]
    s_idx = pl.program_id(1)
    n_s = pl.num_programs(1)

    @pl.when(s_idx == 0)
    def _init():
        agg_ref[...] = jnp.zeros_like(agg_ref)
        asum_ref[...] = jnp.zeros_like(asum_ref)

    x32 = x_ref[0].astype(jnp.float32)                   # (C, tS)
    x_c = x32.astype(compute_dtype)                      # no-op on the f32 path

    # Descriptor-wise inverse L2 norm, folded into logits / assignments
    # (no normalized (C, tS) tensor is ever materialized).
    ssq = jnp.sum(x32 * x32, axis=0, keepdims=True)      # (1, tS)
    inv = lax.rsqrt(jnp.maximum(ssq, EPS * EPS))         # = 1 / max(||x||, eps)
    norm = jnp.maximum(jnp.sqrt(ssq), EPS)               # = 1 / inv (up to rounding)

    # Soft assignment: 1x1 conv == W @ x, softmax over clusters (sublane axis).
    logits = jnp.dot(w_ref[...], x_c,
                     preferred_element_type=jnp.float32) * inv + b_ref[...]
    m = jnp.max(logits, axis=0, keepdims=True)           # (1, tS)
    e = jnp.exp(logits - m)                              # (K, tS)
    denom = jnp.sum(e, axis=0, keepdims=True)            # (1, tS)
    a = e * pl.reciprocal(denom, approx=approx_recip)    # (K, tS)
    a_prime = (a * inv).astype(compute_dtype)            # (K, tS)

    # agg[c,k] += sum_s x[c,s] * a'[k,s].  Big (C, tS) operand is the LHS with
    # its contraction dim trailing, so only the small (K, tS) RHS can pick up
    # a lowering transpose.
    agg_ref[...] += lax.dot_general(
        x_c, a_prime,
        dimension_numbers=(((1,), (1,)), ((), ())),
        preferred_element_type=jnp.float32)               # (C, K)

    # asum[k] += sum_s a[k,s] == sum_s norm[s] * a'[k,s] -- folded into a tiny
    # MXU dot (replaces a cross-lane XLU reduce; lands in (1, K) layout).
    asum_ref[...] += lax.dot_general(
        norm.astype(compute_dtype), a_prime,
        dimension_numbers=(((1,), (1,)), ((), ())),
        preferred_element_type=jnp.float32)               # (1, K)

    @pl.when(s_idx == n_s - 1)
    def _finalize():
        vlad = agg_ref[...] - cent_ref[...] * asum_ref[...]    # (C, K)
        # intra-normalization (per cluster == per lane k) ...
        vnsq = jnp.sum(vlad * vlad, axis=0, keepdims=True)     # (1, K)
        vlad = vlad * lax.rsqrt(jnp.maximum(vnsq, EPS * EPS))  # (C, K)
        # ... then global L2 normalization (same order as the reference).
        gnsq = jnp.sum(vlad * vlad)                            # scalar
        out_ref[0] = (vlad * lax.rsqrt(jnp.maximum(gnsq, EPS * EPS))
                      ).astype(out_ref.dtype)


def _tpu_vmem_capacity_bytes():
    try:
        return int(pltpu.get_tpu_info().vmem_capacity_bytes)
    except Exception:
        return 64 * 2**20  # conservative default (v7x per-core VMEM)


def _choose_s_tile(S, C, budget_bytes):
    """Largest multiple-of-128 divisor of S whose (C, tS) f32 tile fits budget."""
    if S <= 256:
        return S
    max_ts = max(128, (budget_bytes // (4 * C)) // 128 * 128)
    best = None
    t = 128
    while t <= min(S, max_ts):
        if S % t == 0:
            best = t
        t += 128
    # No multiple-of-128 divisor below the cap: fall back to full S (keeps the
    # lane-layout constraint; never pad -> no spurious softmax mass on pad lanes).
    return best if best is not None else S


def netvlad_forward(x_nchw, conv_w, conv_b, centroids, *,
                    compute_dtype=jnp.float32):
    """x_nchw: (N, C, H, W); conv_w: (K, C, 1, 1); conv_b: (K,); centroids: (K, C)."""
    N, C, H, W = x_nchw.shape
    K = centroids.shape[0]
    S = H * W

    # Free reshape only (contiguous NCHW) -- no HBM transpose of activations.
    x = x_nchw.reshape(N, C, S)
    w = conv_w.reshape(K, C).astype(compute_dtype)            # pre-cast once
    b = conv_b.reshape(K, 1).astype(jnp.float32)
    cent_ck = jnp.transpose(centroids.astype(jnp.float32))    # (C, K), tiny

    # Chip-aware tile budget: big lane-dense tiles on 128 MiB chips (v5e/v6e),
    # tighter budget on v7x's 64 MiB.
    vmem_cap = _tpu_vmem_capacity_bytes()
    big_vmem = vmem_cap >= 96 * 2**20
    tS = _choose_s_tile(S, C, (10 << 20) if big_vmem else (2 << 20))
    grid = (N, S // tS)

    xb = np.dtype(x.dtype).itemsize
    cb = np.dtype(compute_dtype).itemsize
    est = (2 * C * tS * xb                      # x tile, double-buffered
           + C * tS * cb                        # in-kernel cast of x (bf16 path)
           + 8 * K * tS * 4                     # logits / exp / a / a' temporaries
           + 2 * C * K * 4                      # output block, double-buffered
           + (C * K + K) * 4                    # agg / asum scratch
           + 2 * (K * C * (cb + 4) + K * 4))    # w, centroids, bias
    vmem_limit = int(min(vmem_cap * 15 // 16, max(vmem_cap * 3 // 4, 2 * est)))

    kernel = functools.partial(
        netvlad_kernel,
        compute_dtype=compute_dtype,
        approx_recip=(compute_dtype != jnp.float32))

    # TODO(synk): batch-1 on v7x leaves one TensorCore idle; an S-split across
    # cores with a small combine step would recover the ~2x.
    # TODO(synk): the constant w/b/centroid blocks could be single-buffered
    # (pipeline_mode=pl.Buffered(1)) to shave a few hundred KB of VMEM.
    out_ck = pl.pallas_call(
        kernel,
        out_shape=jax.ShapeDtypeStruct((N, C, K), jnp.float32),
        grid_spec=pltpu.PrefetchScalarGridSpec(
            num_scalar_prefetch=0,
            grid=grid,
            in_specs=[
                pl.BlockSpec((1, C, tS), lambda n, s: (n, 0, s)),
                pl.BlockSpec((K, C), lambda n, s: (0, 0)),
                pl.BlockSpec((K, 1), lambda n, s: (0, 0)),
                pl.BlockSpec((C, K), lambda n, s: (0, 0)),
            ],
            out_specs=pl.BlockSpec((1, C, K), lambda n, s: (n, 0, 0)),
            scratch_shapes=[
                pltpu.VMEM((C, K), jnp.float32),
                pltpu.VMEM((1, K), jnp.float32),
            ],
        ),
        compiler_params=pltpu.CompilerParams(
            dimension_semantics=("parallel", "arbitrary"),
            vmem_limit_bytes=vmem_limit,
        ),
    )(x, w, b, cent_ck)

    # Tiny (N, C, K) -> (N, K, C) layout fix in the wrapper, then flatten.
    return out_ck.transpose(0, 2, 1).reshape(N, K * C)


def netvlad_reference(x_nchw, conv_w, conv_b, centroids):
    """Pure-JAX reference mirroring the PyTorch forward exactly."""
    N, C, H, W = x_nchw.shape
    K = centroids.shape[0]
    x = x_nchw / jnp.maximum(
        jnp.sqrt(jnp.sum(x_nchw * x_nchw, axis=1, keepdims=True)), EPS
    )
    x_flat = x.reshape(N, C, H * W)                              # (N, C, S)
    logits = jnp.einsum("ncs,kc->nks", x_flat, conv_w.reshape(K, C)) + conv_b[None, :, None]
    a = jax.nn.softmax(logits, axis=1)                           # (N, K, S)
    residual = x_flat[:, None, :, :] - centroids[None, :, :, None]
    residual = residual * a[:, :, None, :]
    vlad = jnp.sum(residual, axis=-1)                            # (N, K, C)
    vlad = vlad / jnp.maximum(
        jnp.sqrt(jnp.sum(vlad * vlad, axis=2, keepdims=True)), EPS
    )
    vlad = vlad.reshape(N, K * C)
    vlad = vlad / jnp.maximum(
        jnp.sqrt(jnp.sum(vlad * vlad, axis=1, keepdims=True)), EPS
    )
    return vlad


if __name__ == "__main__":
    # Small, module-consistent shapes: num_clusters=9 (default), dim=64, 8x8 map.
    N, C, H, W = 2, 64, 8, 8
    K = 9

    key = jax.random.PRNGKey(0)
    kx, kw, kb, kc = jax.random.split(key, 4)

    x = jax.random.normal(kx, (N, C, H, W), dtype=jnp.float32)
    conv_w = jax.random.normal(kw, (K, C, 1, 1), dtype=jnp.float32) * 0.1
    conv_b = jax.random.normal(kb, (K,), dtype=jnp.float32) * 0.1
    centroids = jax.random.uniform(kc, (K, C), dtype=jnp.float32)

    ref = netvlad_reference(x, conv_w, conv_b, centroids)

    # f32 path (default): strict check vs the PyTorch-equivalent reference.
    out = jax.block_until_ready(netvlad_forward(x, conv_w, conv_b, centroids))
    assert out.shape == (N, K * C)
    assert jnp.allclose(out, ref, atol=1e-5, rtol=1e-5), "f32 path mismatch"

    # bf16 MXU perf path: relaxed tolerance.
    out_bf16 = jax.block_until_ready(
        netvlad_forward(x, conv_w, conv_b, centroids, compute_dtype=jnp.bfloat16))
    assert out_bf16.shape == (N, K * C)
    assert jnp.allclose(out_bf16, ref, atol=2e-2, rtol=2e-2), "bf16 path mismatch"

    print("KERNEL_OK")
</pallas_src>

<mosaic_0001>
module attributes {stable_mosaic.version = 11 : i64} {
  func.func @netvlad_kernel(%arg0: i32, %arg1: i32, %arg2: memref<1x64x64xf32, #tpu.memory_space<vmem>>, %arg3: memref<9x64xf32, #tpu.memory_space<vmem>>, %arg4: memref<9x1xf32, #tpu.memory_space<vmem>>, %arg5: memref<64x9xf32, #tpu.memory_space<vmem>>, %arg6: memref<1x64x9xf32, #tpu.memory_space<vmem>>, %arg7: memref<64x9xf32, #tpu.memory_space<vmem>>, %arg8: memref<1x9xf32, #tpu.memory_space<vmem>>) attributes {dimension_semantics = [#tpu.dimension_semantics<parallel>, #tpu.dimension_semantics<arbitrary>], iteration_bounds = array<i64: 2, 1>, scalar_prefetch = 0 : i64, scratch_operands = 2 : i64, tpu.core_type = #tpu.core_type<tc>, window_params = [{transform_indices = @transform_0, window_bounds = array<i64: 1, 64, 64>}, {pipeline_mode = #tpu.pipeline_mode<synchronous>, transform_indices = @transform_1, window_bounds = array<i64: 9, 64>}, {pipeline_mode = #tpu.pipeline_mode<synchronous>, transform_indices = @transform_2, window_bounds = array<i64: 9, 1>}, {pipeline_mode = #tpu.pipeline_mode<synchronous>, transform_indices = @transform_3, window_bounds = array<i64: 64, 9>}, {transform_indices = @transform_4, window_bounds = array<i64: 1, 64, 9>}]} {
    %c0_i32 = arith.constant 0 : i32
    %0 = arith.cmpi eq, %arg1, %c0_i32 : i32
    %1 = arith.extui %0 : i1 to i32
    %c0_i32_0 = arith.constant 0 : i32
    %2 = arith.cmpi ne, %1, %c0_i32_0 : i32
    scf.if %2 {
      %cst_24 = arith.constant 0.000000e+00 : f32
      %44 = vector.broadcast %cst_24 : f32 to vector<64x9xf32>
      %c0_25 = arith.constant 0 : index
      %c0_26 = arith.constant 0 : index
      %45 = vector.load %arg7[%c0_25, %c0_26] : memref<64x9xf32, #tpu.memory_space<vmem>>, vector<64x9xf32>
      tpu.vector_store %arg7[%c0_25, %c0_26], %44 {strides = array<i32>} : memref<64x9xf32, #tpu.memory_space<vmem>>, vector<64x9xf32>,
      %cst_27 = arith.constant 0.000000e+00 : f32
      %46 = vector.broadcast %cst_27 : f32 to vector<1x9xf32>
      %c0_28 = arith.constant 0 : index
      %c0_29 = arith.constant 0 : index
      %47 = vector.load %arg8[%c0_28, %c0_29] : memref<1x9xf32, #tpu.memory_space<vmem>>, vector<1x9xf32>
      tpu.vector_store %arg8[%c0_28, %c0_29], %46 {strides = array<i32>} : memref<1x9xf32, #tpu.memory_space<vmem>>, vector<1x9xf32>,
    } else {
    }
    %c0 = arith.constant 0 : index
    %c0_1 = arith.constant 0 : index
    %c0_2 = arith.constant 0 : index
    %3 = vector.load %arg2[%c0, %c0_1, %c0_2] : memref<1x64x64xf32, #tpu.memory_space<vmem>>, vector<1x64x64xf32>
    %4 = vector.shape_cast %3 : vector<1x64x64xf32> to vector<64x64xf32>
    %5 = arith.mulf %4, %4 : vector<64x64xf32>
    %cst = arith.constant dense<0.000000e+00> : vector<64xf32>
    %6 = vector.multi_reduction <add>, %5, %cst [0] : vector<64x64xf32> to vector<64xf32>
    %7 = vector.shape_cast %6 : vector<64xf32> to vector<1x64xf32>
    %cst_3 = arith.constant 1.000000e-24 : f32
    %8 = vector.broadcast %cst_3 : f32 to vector<1x64xf32>
    %9 = arith.maximumf %7, %8 : vector<1x64xf32>
    %10 = math.rsqrt %9 : vector<1x64xf32>
    %11 = math.sqrt %7 : vector<1x64xf32>
    %cst_4 = arith.constant 9.99999996E-13 : f32
    %12 = vector.broadcast %cst_4 : f32 to vector<1x64xf32>
    %13 = arith.maximumf %11, %12 : vector<1x64xf32>
    %c0_5 = arith.constant 0 : index
    %c0_6 = arith.constant 0 : index
    %14 = vector.load %arg3[%c0_5, %c0_6] : memref<9x64xf32, #tpu.memory_space<vmem>>, vector<9x64xf32>
    %cst_7 = arith.constant dense<0.000000e+00> : vector<9x64xf32>
    %15 = tpu.matmul %14, %4, %cst_7 {dimension_numbers = #tpu.dot_dimension_numbers<[1], [0], [0], [1], [0, 0, 1, 1], [], []>} : vector<9x64xf32>, vector<64x64xf32>, vector<9x64xf32> -> vector<9x64xf32>
    %16 = vector.broadcast %10 : vector<1x64xf32> to vector<9x64xf32>
    %17 = arith.mulf %15, %16 : vector<9x64xf32>
    %c0_8 = arith.constant 0 : index
    %c0_9 = arith.constant 0 : index
    %18 = vector.load %arg4[%c0_8, %c0_9] : memref<9x1xf32, #tpu.memory_space<vmem>>, vector<9x1xf32>
    %19 = vector.broadcast %18 : vector<9x1xf32> to vector<9x64xf32>
    %20 = arith.addf %17, %19 : vector<9x64xf32>
    %cst_10 = arith.constant dense<0xFF800000> : vector<64xf32>
    %21 = vector.multi_reduction <maximumf>, %20, %cst_10 [0] : vector<9x64xf32> to vector<64xf32>
    %22 = vector.shape_cast %21 : vector<64xf32> to vector<1x64xf32>
    %23 = vector.broadcast %22 : vector<1x64xf32> to vector<9x64xf32>
    %24 = arith.subf %20, %23 : vector<9x64xf32>
    %25 = math.exp %24 : vector<9x64xf32>
    %cst_11 = arith.constant dense<0.000000e+00> : vector<64xf32>
    %26 = vector.multi_reduction <add>, %25, %cst_11 [0] : vector<9x64xf32> to vector<64xf32>
    %27 = vector.shape_cast %26 : vector<64xf32> to vector<1x64xf32>
    %28 = tpu.reciprocal %27 : vector<1x64xf32> -> vector<1x64xf32>
    %29 = vector.broadcast %28 : vector<1x64xf32> to vector<9x64xf32>
    %30 = arith.mulf %25, %29 : vector<9x64xf32>
    %31 = vector.broadcast %10 : vector<1x64xf32> to vector<9x64xf32>
    %32 = arith.mulf %30, %31 : vector<9x64xf32>
    %c0_12 = arith.constant 0 : index
    %c0_13 = arith.constant 0 : index
    %33 = vector.load %arg7[%c0_12, %c0_13] : memref<64x9xf32, #tpu.memory_space<vmem>>, vector<64x9xf32>
    %cst_14 = arith.constant dense<0.000000e+00> : vector<64x9xf32>
    %34 = tpu.matmul %4, %32, %cst_14 {dimension_numbers = #tpu.dot_dimension_numbers<[1], [1], [0], [0], [0, 0, 1, 0], [], []>} : vector<64x64xf32>, vector<9x64xf32>, vector<64x9xf32> -> vector<64x9xf32>
    %35 = arith.addf %33, %34 : vector<64x9xf32>
    %c0_15 = arith.constant 0 : index
    %c0_16 = arith.constant 0 : index
    %36 = vector.load %arg7[%c0_15, %c0_16] : memref<64x9xf32, #tpu.memory_space<vmem>>, vector<64x9xf32>
    tpu.vector_store %arg7[%c0_15, %c0_16], %35 {strides = array<i32>} : memref<64x9xf32, #tpu.memory_space<vmem>>, vector<64x9xf32>,
    %c0_17 = arith.constant 0 : index
    %c0_18 = arith.constant 0 : index
    %37 = vector.load %arg8[%c0_17, %c0_18] : memref<1x9xf32, #tpu.memory_space<vmem>>, vector<1x9xf32>
    %cst_19 = arith.constant dense<0.000000e+00> : vector<1x9xf32>
    %38 = tpu.matmul %13, %32, %cst_19 {dimension_numbers = #tpu.dot_dimension_numbers<[1], [1], [0], [0], [0, 0, 1, 0], [], []>} : vector<1x64xf32>, vector<9x64xf32>, vector<1x9xf32> -> vector<1x9xf32>
    %39 = arith.addf %37, %38 : vector<1x9xf32>
    %c0_20 = arith.constant 0 : index
    %c0_21 = arith.constant 0 : index
    %40 = vector.load %arg8[%c0_20, %c0_21] : memref<1x9xf32, #tpu.memory_space<vmem>>, vector<1x9xf32>
    tpu.vector_store %arg8[%c0_20, %c0_21], %39 {strides = array<i32>} : memref<1x9xf32, #tpu.memory_space<vmem>>, vector<1x9xf32>,
    %c0_i32_22 = arith.constant 0 : i32
    %41 = arith.cmpi eq, %arg1, %c0_i32_22 : i32
    %42 = arith.extui %41 : i1 to i32
    %c0_i32_23 = arith.constant 0 : i32
    %43 = arith.cmpi ne, %42, %c0_i32_23 : i32
    scf.if %43 {
      %c0_24 = arith.constant 0 : index
      %c0_25 = arith.constant 0 : index
      %44 = vector.load %arg7[%c0_24, %c0_25] : memref<64x9xf32, #tpu.memory_space<vmem>>, vector<64x9xf32>
      %c0_26 = arith.constant 0 : index
      %c0_27 = arith.constant 0 : index
      %45 = vector.load %arg5[%c0_26, %c0_27] : memref<64x9xf32, #tpu.memory_space<vmem>>, vector<64x9xf32>
      %c0_28 = arith.constant 0 : index
      %c0_29 = arith.constant 0 : index
      %46 = vector.load %arg8[%c0_28, %c0_29] : memref<1x9xf32, #tpu.memory_space<vmem>>, vector<1x9xf32>
      %47 = vector.broadcast %46 : vector<1x9xf32> to vector<64x9xf32>
      %48 = arith.mulf %45, %47 : vector<64x9xf32>
      %49 = arith.subf %44, %48 : vector<64x9xf32>
      %50 = arith.mulf %49, %49 : vector<64x9xf32>
      %cst_30 = arith.constant dense<0.000000e+00> : vector<9xf32>
      %51 = vector.multi_reduction <add>, %50, %cst_30 [0] : vector<64x9xf32> to vector<9xf32>
      %52 = vector.shape_cast %51 : vector<9xf32> to vector<1x9xf32>
      %cst_31 = arith.constant 1.000000e-24 : f32
      %53 = vector.broadcast %cst_31 : f32 to vector<1x9xf32>
      %54 = arith.maximumf %52, %53 : vector<1x9xf32>
      %55 = math.rsqrt %54 : vector<1x9xf32>
      %56 = vector.broadcast %55 : vector<1x9xf32> to vector<64x9xf32>
      %57 = arith.mulf %49, %56 : vector<64x9xf32>
      %58 = arith.mulf %57, %57 : vector<64x9xf32>
      %59 = vector.shape_cast %58 : vector<64x9xf32> to vector<1x64x9xf32>
      %cst_32 = arith.constant dense<0.000000e+00> : vector<1xf32>
      %60 = vector.multi_reduction <add>, %59, %cst_32 [1, 2] : vector<1x64x9xf32> to vector<1xf32>
      %61 = vector.shape_cast %60 : vector<1xf32> to vector<1x1x1xf32>
      %62 = vector.extract %61[0, 0, 0] : f32 from vector<1x1x1xf32>
      %cst_33 = arith.constant 1.000000e-24 : f32
      %63 = arith.maximumf %62, %cst_33 : f32
      %64 = math.rsqrt %63 : f32
      %65 = vector.broadcast %64 : f32 to vector<64x9xf32>
      %66 = arith.mulf %57, %65 : vector<64x9xf32>
      %c0_34 = arith.constant 0 : index
      %c0_35 = arith.constant 0 : index
      %c0_36 = arith.constant 0 : index
      %67 = vector.load %arg6[%c0_34, %c0_35, %c0_36] : memref<1x64x9xf32, #tpu.memory_space<vmem>>, vector<1x64x9xf32>
      %68 = vector.shape_cast %67 : vector<1x64x9xf32> to vector<64x9xf32>
      %69 = vector.shape_cast %66 : vector<64x9xf32> to vector<1x64x9xf32>
      tpu.vector_store %arg6[%c0_34, %c0_35, %c0_36], %69 {strides = array<i32>} : memref<1x64x9xf32, #tpu.memory_space<vmem>>, vector<1x64x9xf32>,
    } else {
    }
    return
  }
  func.func @transform_0(%arg0: i32, %arg1: i32) -> (i32, i32, i32) {
    %c0_i32 = arith.constant 0 : i32
    %c0_i32_0 = arith.constant 0 : i32
    return %arg0, %c0_i32, %arg1 : i32, i32, i32
  }
  func.func @transform_1(%arg0: i32, %arg1: i32) -> (i32, i32) {
    %c0_i32 = arith.constant 0 : i32
    %c0_i32_0 = arith.constant 0 : i32
    %c0_i32_1 = arith.constant 0 : i32
    return %c0_i32, %c0_i32_0 : i32, i32
  }
  func.func @transform_2(%arg0: i32, %arg1: i32) -> (i32, i32) {
    %c0_i32 = arith.constant 0 : i32
    %c0_i32_0 = arith.constant 0 : i32
    %c0_i32_1 = arith.constant 0 : i32
    return %c0_i32, %c0_i32_0 : i32, i32
  }
  func.func @transform_3(%arg0: i32, %arg1: i32) -> (i32, i32) {
    %c0_i32 = arith.constant 0 : i32
    %c0_i32_0 = arith.constant 0 : i32
    %c0_i32_1 = arith.constant 0 : i32
    return %c0_i32, %c0_i32_0 : i32, i32
  }
  func.func @transform_4(%arg0: i32, %arg1: i32) -> (i32, i32, i32) {
    %c0_i32 = arith.constant 0 : i32
    %c0_i32_0 = arith.constant 0 : i32
    %c0_i32_1 = arith.constant 0 : i32
    return %arg0, %c0_i32, %c0_i32_0 : i32, i32, i32
  }
}

</mosaic_0001>

<bundles_post_ra>
// kernel: tpu_custom_call.1
= control target key start
LH: loop header
LB: loop body
LE: loop exit
PB: predicated region body
PF: predicated region fallthrough
CT: control target
= control target key end

     0   :  { %9 = vsyncpa [#allocation5], 0  ;;  %s1470_s0 = inlined_call_operand.hbm [shape: f32[2,64,64], index: 0, kind: input, shape index: {}]   ;;  %s1471_s1 = inlined_call_operand.vmem [shape: f32[9,64], index: 1, kind: input, shape index: {}]   ;;  %s1472_s2 = inlined_call_operand.vmem [shape: f32[9,1], index: 2, kind: input, shape index: {}]   ;;  %s1473_s3 = inlined_call_operand.vmem [shape: f32[64,9], index: 3, kind: input, shape index: {}]   ;;  %s1474_s4 = inlined_call_operand.vmem [shape: f32[2,64,9], index: 4, kind: output, shape index: {}]  }
   0x1   :  { %11 = vsyncpa [#allocation5 + $0x1], 0  ;;  %s1191_s15 = smov 0   ;;  %s1193_s16 = smov 0  }
   0x2   :  { %s1195_s17 = smov 0   ;;  %s1197_s18 = smov 0  }
   0x3   :  { %s1199_s19 = smov 0   ;;  %s1201_s20 = smov 0  }
   0x4 LB: > { %s873_s21 = sadd.s32 4294967295, %s1156_s20   ;;  %s29_s22 = sadd.s32 1, %s1152_s19  ;;  %s1156_s20 = sphi %s1201_s20, %s17_s20   ;;  %s1152_s19 = sphi %s1199_s19, %s1482_s19   ;;  %s1148_s18 = sphi %s1197_s18, %s1481_s18   ;;  %s1144_s17 = sphi %s1195_s17, %s1480_s17   ;;  %s1140_s16 = sphi %s1193_s16, %s1479_s16   ;;  %s1136_s15 = sphi %s1191_s15, %s1478_s15  }
   0x5   : > { %p31_p0 = scmp.ge.s32.totalorder %s29_s22, 2  ;;  %s38_s23 = sadd.s32 1, %s1144_s17 }
   0x6   : > { %p45_p1 = scmp.ne.s32.totalorder %s1144_s17, %s1140_s16  ;;  %p46_p2 = scmp.eq.s32.totalorder %s1156_s20, 0 }
   0x7   : > { %s1484_s22 = smov (%p31_p0, %s29_s22), 0  ;;  %p51_p4 = scmp.ne.s32.totalorder %s1140_s16, %s1136_s15 }
   0x8   : > { %p1227_p3 = por %p46_p2, %p45_p1  ;;  %s33_s25 = ssub.s32 %s1152_s19, %s1484_s22 }
   0x9   : > { %p52_p5 = scmp.eq.s32.totalorder %s873_s21, 0  ;;  %p36_p6 = scmp.eq.s32.totalorder %s33_s25, 0 }
   0xa   : > { %p1005_p8 = scmp.lt.s32.totalorder %s1156_s20, 2  ;;  %s173_s28 = sand.u32 1, %s1144_s17  }
   0xb   : > { %p1234_p7 = por %p52_p5, %p51_p4  ;;  %s902_s29 = sshll.u32 %s1152_s19, 10 }
   0xc   : > { %s1240_s27 = scalar_select %p36_p6, %s1144_s17, %s38_s23  }
   0xd   : > { %s877_s30 = sshll.u32 %s173_s28, 6  ;;  %s1247_s7 = scalar_lea.hbm %s1470_s0, %s902_s29 }
   0xe   : > { %s177_s8 = scalar_lea.vmem [#allocation4], %s877_s30  ;;  %p1251_p9 = pnand %p1005_p8, %p1227_p3 }
   0xf   : > { %s185_s9 = sshll.u32 %s177_s8, 4  ;;  %s1257_s11 = scalar_lea.sflag [#allocation5], %s173_s28  ;;  %s1255_s9 = int_to_ptr.vmem [resolvable:$true] %s185_s9 }
  0x10   : > { %s1076_s12 = scalar_lea.hbm %s1247_s7, 1024  ;;  %p1078_p11 = pneg %p1251_p9 }
  0x11   : > { %p1077_p10 = scmp.ne.s32.totalorder %s1247_s7, %s1076_s12  ;;  %s1081_s15 = scalar_lea.hbm %s1470_s0, 2048 }
  0x12   : > { %p1082_p0 = scmp.lt.u32.totalorder %s1247_s7, %s1470_s0  ;;  %p1083_p1 = scmp.lt.u32.totalorder %s1081_s15, %s1076_s12 }
  0x13   : > { %p1079_p12 = pnand %p1078_p11, %p1077_p10  ;;  %p1085_p3 = scmp.lt.u32.totalorder %s1076_s12, %s1247_s7 }
  0x14   : > { %p1084_p2 = por %p1083_p1, %p1082_p0 }
  0x15   : > { %p1080_p13 = pneg %p1079_p12 }
  0x16   : > { %p1086_p4 = por %p1085_p3, %p1084_p2 }
  0x18   : > { %p1087_p5 = pnand %p1086_p4, %p1080_p13 }
  0x1a   : > { %1090 = shalt.err (!%p1087_p5)
}
  0x1b   : > { %s1091_s24 = scalar_lea.vmem %s1255_s9, 1024  ;;  %s1158_s25 = smov [#allocation4]  }
  0x1c   : > { %p1092_p6 = scmp.ne.s32.totalorder %s1255_s9, %s1091_s24  ;;  %s1096_s28 = sshll.u32 %s1158_s25, 4  ;;  %s1097_s28 = int_to_ptr.vmem [resolvable:$false] %s1096_s28 }
  0x1d   : > { %s1098_s29 = scalar_lea.vmem %s1097_s28, 2048  ;;  %p1099_p12 = scmp.lt.s32.totalorder %s1255_s9, %s1097_s28 }
  0x1e   : > { %p1094_p8 = pnand %p1092_p6, %p1078_p11  ;;  %p1100_p0 = scmp.lt.s32.totalorder %s1098_s29, %s1091_s24 }
  0x20   : > { %p1095_p10 = pneg %p1094_p8  ;;  %p1101_p1 = por %p1100_p0, %p1099_p12 }
  0x22   : > { %p1102_p2 = pnand %p1101_p1, %p1095_p10 }
  0x24   : > { %1105 = shalt.err (!%p1102_p2)
}
  0x25   : > { %s1159_s30 = smov 128   ;;  %s1160_s5 = smov 8  }
  0x26   : > { %1004 = dma.hbm_to_vmem [thread:$0]  (!%p1251_p9), %s1247_s7, 1024, %s1255_s9, %s1257_s11, %s1159_s30, %s1159_s30, %s1160_s5  }
  0x27   : > { %p880_p11 = scmp.ge.s32.totalorder %s1156_s20, 1  ;;  %p193_p13 = scmp.lt.s32.totalorder %s1156_s20, 3 }
  0x29   : > { %p194_p3 = pnand %p880_p11, %p193_p13 }
  0x2a   : > { %s199_s6 = sand.u32 (!%p194_p3), 1, %s1140_s16  }
  0x2b   : > { %197 = sbr.rel (%p194_p3) target bundleno = 920 (0x398), region = 36  ;;  %s881_s8 = sshll.u32 (!%p194_p3), %s199_s6, 6 }
  0x2c   : > { %s200_s12 = scalar_lea.sflag (!%p194_p3), [#allocation5], %s199_s6  ;;  %s203_s13 = scalar_lea.vmem (!%p194_p3), [#allocation4], %s881_s8 }
  0x32   : > { %1131 = dma.done.wait (%p1234_p7), %s200_s12, 1024  }
  0x33   : > { %1133 = vsyncadd (%p1234_p7), %s200_s12, 4294966272  ;;  %v1161_v0 = vmov 0   ;;  %v248_v1 = vld [vmem:[%s203_s13] sm:$0xff]  ;;  %v1292_v2 = vld [vmem:[%s203_s13 + $0x8] sm:$0xff]  ;;  %vm264_vm0 = vcmask 523264   ;;  %v1162_v17 = vmov 0.0|0.0  }
  0x34   : > { %1061 = vset.pattern.permute.xlu0 %v1161_v0  ;;  %v1294_v3 = vld [vmem:[%s203_s13 + $0x10] sm:$0xff]  ;;  %v969_v4 = vpack.c.bf16 %v1292_v2, %v248_v1  ;;  %v1297_v5 = vld [vmem:[%s203_s13 + $0x18] sm:$0xff]  ;;  %950 = vmatprep.mubr.msk.f32.mxu1 %vm264_vm0, %v248_v1  ;;  %v1302_v7 = vld [vmem:[%s203_s13 + $0x20] sm:$0xff]  ;;  %v256_v18 = vmul.f32 %v248_v1, %v248_v1  ;;  %v257_v19 = vmul.f32 %v1292_v2, %v1292_v2  ;;  %vm1163_vm1 = vmmov 0   ;;  %s1165_s15 = smov 1e-24  }
  0x35   : > { %v973_v6 = vpack.c.bf16 %v1297_v5, %v1294_v3  ;;  %v1304_v8 = vld [vmem:[%s203_s13 + $0x28] sm:$0xff]  ;;  %v296_v9 = vld [vmem:[%s1471_s1] sm:$0xff]  ;;  %v382_v12 = vld [vmem:[%s1472_s2 + $0x8] sm:$0x1]  ;;  %v258_v22 = vmul.f32 %v1294_v3, %v1294_v3  ;;  %v259_v24 = vmul.f32 %v1297_v5, %v1297_v5  ;;  %v260_v28 = vmul.f32 %v1302_v7, %v1302_v7  ;;  %p228_p7 = scmp.lt.s32.totalorder %s1148_s18, 1 }
  0x36   : > { %970 = vmatprep.subr.bf16.mxu0 %v969_v4  ;;  %943 = vmatprep.mubr.msk.f32.mxu0 %vm264_vm0, %v296_v9  ;;  %v381_v10 = vld [vmem:[%s1472_s2] sm:$0xff]  ;;  %v977_v11 = vpack.c.bf16 %v1304_v8, %v1302_v7  ;;  %v1318_v13 = vld [vmem:[%s203_s13 + $0x30] sm:$0xff]  ;;  %v297_v16 = vld [vmem:[%s1471_s1 + $0x8] sm:$0x1]  ;;  %v265_v20 = vsel %vm264_vm0, %v256_v18, 0.0  ;;  %v266_v21 = vsel %vm264_vm0, %v257_v19, 0.0  ;;  %v261_v30 = vmul.f32 %v1304_v8, %v1304_v8 }
  0x37   : > { %972 = vmatpush3.bf16.msra.mxu0 %v969_v4  ;;  %385 = vperm.xlu0 %1061, %v381_v10   ;;  %v1320_v14 = vld [vmem:[%s203_s13 + $0x38] sm:$0xff]  ;;  %v267_v23 = vadd.f32 %v266_v21, %v265_v20  ;;  %v268_v25 = vsel %vm264_vm0, %v258_v22, 0.0  ;;  %v270_v27 = vsel %vm264_vm0, %v259_v24, 0.0  ;;  %v272_v31 = vsel %vm264_vm0, %v260_v28, 0.0  ;;  %vm986_vm5 = vmpackc.low %vm264_vm0, %vm264_vm0  ;;  %s1486_s18 = smov (!%p228_p7, %s1148_s18), 1 }
  0x38   : > { %974 = vmatprep.subr.bf16.mxu0 %v973_v6  ;;  %v981_v15 = vpack.c.bf16 %v1320_v14, %v1318_v13  ;;  %v1164_v32 = vmov 0.0   ;;  %v274_v34 = vsel %vm264_vm0, %v261_v30, 0.0  ;;  %v262_v35 = vmul.f32 %v1318_v13, %v1318_v13  ;;  %s903_s23 = sshll.u32 %s1486_s18, 6 }
  0x39   : > { %v269_v26 = vadd.f32 %v268_v25, %v267_v23  ;;  %v263_v37 = vmul.f32 %v1320_v14, %v1320_v14  ;;  %vm246_vm2 = vcmask 65536   ;;  %vm396_vm3 = vcmask 516096   ;;  %s232_s29 = scalar_lea.vmem %s1474_s4, %s903_s23 }
  0x3a   : > { %v276_v38 = vsel %vm264_vm0, %v262_v35, 0.0  ;;  %247 = vst.msk [vmem:[#allocation3] sm:$0x1] %vm246_vm2, %v1164_v32  ;;  %vm237_vm7 = vcmask 72704  }
  0x3b   : > { %976 = vmatpush3.bf16.msra.mxu0 %v973_v6  ;;  %390 = vperm.xlu0 %1061, %v382_v12   ;;  %v271_v29 = vadd.f32 %v270_v27, %v269_v26  ;;  %v278_v40 = vsel %vm264_vm0, %v263_v37, 0.0  ;;  %239 = vst.msk [vmem:[#allocation2 + $0x8] sm:$0xff] %vm237_vm7, %v1164_v32  ;;  %238 = vst.msk [vmem:[#allocation2] sm:$0xff] %vm237_vm7, %v1164_v32 }
  0x3c   : > { %978 = vmatprep.subr.bf16.mxu0 %v977_v11  ;;  %240 = vst.msk [vmem:[#allocation2 + $0x10] sm:$0xff] %vm237_vm7, %v1164_v32  ;;  %241 = vst.msk [vmem:[#allocation2 + $0x18] sm:$0xff] %vm237_vm7, %v1164_v32 }
  0x3d   : > { %v273_v33 = vadd.f32 %v272_v31, %v271_v29  ;;  %242 = vst.msk [vmem:[#allocation2 + $0x20] sm:$0xff] %vm237_vm7, %v1164_v32  ;;  %243 = vst.msk [vmem:[#allocation2 + $0x28] sm:$0xff] %vm237_vm7, %v1164_v32 }
  0x3e   : > { %244 = vst.msk [vmem:[#allocation2 + $0x30] sm:$0xff] %vm237_vm7, %v1164_v32  ;;  %245 = vst.msk [vmem:[#allocation2 + $0x38] sm:$0xff] %vm237_vm7, %v1164_v32 }
  0x3f   : > { %980 = vmatpush3.bf16.msra.mxu0 %v977_v11  ;;  %v275_v36 = vadd.f32 %v274_v34, %v273_v33 }
  0x40   : > { %982 = vmatprep.subr.bf16.mxu0 %v981_v15 }
  0x41   : > { %v277_v39 = vadd.f32 %v276_v38, %v275_v36 }
  0x43   : > { %984 = vmatpush3.bf16.msra.mxu0 %v981_v15  ;;  %v279_v41 = vadd.f32 %v278_v40, %v277_v39 }
  0x44   : > { %991 = vmatprep.subr.bf16.mxu0 %v1162_v17 }
  0x45   : > { %v280_v42 = vrot.slane %v279_v41, 4 }
  0x46   : > { %944 = vmatmul.mubr.msk.f32.vlgmr.msra.gmra.mrb[0].mxu0 %vm264_vm0, %v297_v16 }
  0x47   : > { %966 = vmatprep.mubr.msk.f32.mxu0 %vm1163_vm1, %v1164_v32  ;;  %v281_v43 = vadd.f32 %v280_v42, %v279_v41  ;;  %v428_v41 = vld [vmem:[#allocation2 + $0x18] sm:$0xff]  ;;  %v427_v42 = vld [vmem:[#allocation2 + $0x10] sm:$0xff] }
  0x49   : > { %v282_v44 = vrot.slane %v281_v43, 2 }
  0x4b   : > { %v283_v45 = vadd.f32 %v282_v44, %v281_v43 }
  0x4d   : > { %v284_v46 = vrot.slane %v283_v45, 1 }
  0x4f   : > { %v285_v47 = vadd.f32 %v284_v46, %v283_v45  ;;  %v430_v46 = vld [vmem:[#allocation2 + $0x28] sm:$0xff] }
  0x51   : > { %v286_v48 = vmax.f32 %v285_v47, 1e-24  ;;  %vm290_vm4 = vcmp.eq.f32.partialorder %v285_v47, inf  ;;  %v293_v33 = vand.u32 2147483648, %v285_v47  ;;  %vm292_vm6 = vcmp.eq.f32.partialorder %v285_v47, 0.0 }
  0x53   : > { %1062 = vrsqrt.f32 %v286_v48  ;;  %v673_v48 = vld [vmem:[%s1473_s3] sm:$0xff] }
  0x5d   : > { %v1063_v50 = vpop.eup %1062 }
  0xb6   : > { %v386_v49 = vpop.permute.xlu0 %385 }
  0xba   : > { %v391_v54 = vpop.permute.xlu0 %390 }
 0x119   : > { %v945_v51 = vpop.f32.mrb[0].mxu0 }
 0x11a   : > { %v380_v52 = vmul.f32 %v1063_v50, %v945_v51  ;;  %v370_v53 = vpop.f32.mrb[1].mxu0  ;;  %v676_v51 = vld [vmem:[%s1473_s3 + $0x18] sm:$0xff] }
 0x11b   : > { %v379_v55 = vmul.f32 %v1063_v50, %v370_v53 }
 0x11c   : > { %v394_v56 = vadd.f32 %v391_v54, %v380_v52 }
 0x11d   : > { %v393_v57 = vadd.f32 %v386_v49, %v379_v55  ;;  %v674_v49 = vld [vmem:[%s1473_s3 + $0x8] sm:$0xff] }
 0x11e   : > { %v397_v58 = vsel %vm396_vm3, %v394_v56, -inf }
 0x11f   : > { %v395_v59 = vsel %vm264_vm0, %v393_v57, -inf }
 0x120   : > { %v398_v60 = vmax.f32 %v395_v59, %v397_v58 }
 0x122   : > { %v399_v61 = vrot.slane %v398_v60, 4 }
 0x124   : > { %v400_v62 = vmax.f32 %v398_v60, %v399_v61  ;;  %v431_v60 = vld [vmem:[#allocation2 + $0x30] sm:$0xff] }
 0x126   : > { %v401_v63 = vrot.slane %v400_v62, 2 }
 0x128   : > { %v402_v0 = vmax.f32 %v400_v62, %v401_v63  ;;  %v675_v62 = vld [vmem:[%s1473_s3 + $0x10] sm:$0xff] }
 0x12a   : > { %v403_v1 = vrot.slane %v402_v0, 1 }
 0x12c   : > { %v404_v4 = vmax.f32 %v402_v0, %v403_v1 }
 0x12e   : > { %v405_v6 = vsub.f32 %v393_v57, %v404_v4  ;;  %v406_v9 = vsub.f32 %v394_v56, %v404_v4  ;;  %v432_v56 = vld [vmem:[#allocation2 + $0x38] sm:$0xff] }
 0x130   : > { %v407_v10 = vmul.f32 1.442695, %v405_v6  ;;  %v409_v11 = vmul.f32 1.442695, %v406_v9 }
 0x132   : > { %1064 = vpow2.f32 %v407_v10 }
 0x133   : > { %1066 = vpow2.f32 %v409_v11 }
 0x134   : > { %1068 = vrsqrt.f32 %v285_v47 }
 0x13c   : > { %v1065_v12 = vpop.eup %1064 }
 0x13d   : > { %v1067_v15 = vpop.eup %1066  ;;  %v411_v16 = vsel %vm264_vm0, %v1065_v12, 0.0 }
 0x13e   : > { %v412_v17 = vsel %vm396_vm3, %v1067_v15, 0.0  ;;  %v1069_v25 = vpop.eup %1068 }
 0x13f   : > { %v413_v18 = vadd.f32 %v412_v17, %v411_v16  ;;  %v289_v27 = vmul.f32 %v1069_v25, %v285_v47 }
 0x141   : > { %v414_v19 = vrot.slane %v413_v18, 4  ;;  %v291_v34 = vsel %vm290_vm4, %v285_v47, %v289_v27  ;;  %v429_v47 = vld [vmem:[#allocation2 + $0x20] sm:$0xff] }
 0x142   : > { %v294_v36 = vsel %vm292_vm6, %v293_v33, %v291_v34 }
 0x143   : > { %v415_v20 = vadd.f32 %v414_v19, %v413_v18  ;;  %v295_v37 = vmax.f32 %v294_v36, 1e-12  ;;  %v677_v19 = vld [vmem:[%s1473_s3 + $0x20] sm:$0xff] }
 0x145   : > { %v416_v21 = vrot.slane %v415_v20, 2 }
 0x147   : > { %v417_v22 = vadd.f32 %v416_v21, %v415_v20 }
 0x149   : > { %v418_v23 = vrot.slane %v417_v22, 1 }
 0x14b   : > { %v419_v24 = vadd.f32 %v418_v23, %v417_v22 }
 0x14d   : > { %1070 = vrcp.f32 %v419_v24 }
 0x157   : > { %v1071_v26 = vpop.eup %1070 }
 0x158   : > { %v421_v28 = vmul.f32 %v1071_v26, %v1065_v12  ;;  %v422_v29 = vmul.f32 %v1071_v26, %v1067_v15  ;;  %v678_v12 = vld [vmem:[%s1473_s3 + $0x28] sm:$0xff]  ;;  %v680_v26 = vld [vmem:[%s1473_s3 + $0x38] sm:$0xff] }
 0x15a   : > { %v423_v30 = vmul.f32 %v1063_v50, %v421_v28  ;;  %v424_v31 = vmul.f32 %v1063_v50, %v422_v29 }
 0x15c   : > { %v985_v35 = vpack.c.bf16 %v424_v31, %v423_v30  ;;  %v679_v31 = vld [vmem:[%s1473_s3 + $0x30] sm:$0xff] }
 0x15e   : > { %987 = vmatprep.subr.msk.bf16.mxu1 %vm986_vm5, %v985_v35  ;;  %994 = vmatpush3.bf16.xpose.msk.msra.mxu0 %vm986_vm5, %v985_v35 }
 0x15f   : > { %990 = vmatpush3.bf16.xpose.msk.msra.mxu1 %vm986_vm5, %v985_v35 }
 0x165   : > { %967 = vmatmul.mubr.msk.f32.vlgmr.msra.gmra.mrb[2].mxu0 %vm264_vm0, %v295_v37 }
 0x166   : > { %951 = vmatmul.mubr.msk.f32.vlgmr.msra.gmra.mrb[0].mxu1 %vm264_vm0, %v1292_v2  ;;  %v585_v2 = vld [vmem:[#allocation3] sm:$0x1] }
 0x167   : > { %953 = vmatprep.mubr.msk.f32.mxu1 %vm264_vm0, %v1294_v3  ;;  %v426_v3 = vld [vmem:[#allocation2 + $0x8] sm:$0xff] }
 0x16a   : > { %954 = vmatmul.mubr.msk.f32.gmra.mrb[2].mxu1 %vm264_vm0, %v1297_v5 }
 0x16b   : > { %956 = vmatprep.mubr.msk.f32.mxu1 %vm264_vm0, %v1302_v7  ;;  %v425_v7 = vld [vmem:[#allocation2] sm:$0xff] }
 0x16e   : > { %957 = vmatmul.mubr.msk.f32.gmra.mrb[4].mxu1 %vm264_vm0, %v1304_v8 }
 0x16f   : > { %959 = vmatprep.mubr.msk.f32.mxu1 %vm264_vm0, %v1318_v13 }
 0x172   : > { %960 = vmatmul.mubr.msk.f32.gmra.mrb[6].mxu1 %vm264_vm0, %v1320_v14 }
 0x238   : > { %v655_v5 = vpop.f32.mrb[2].mxu0 }
 0x239   : > { %v659_v8 = vadd.f32 %v655_v5, %v585_v2  ;;  %v952_v13 = vpop.f32.mrb[0].mxu1  ;;  %v968_v14 = vpop.f32.mrb[3].mxu0 }
 0x23a   : > { %v569_v38 = vadd.f32 %v952_v13, %v426_v3  ;;  %v529_v39 = vpop.f32.mrb[1].mxu1 }
 0x23b   : > { %661 = vst.msk [vmem:[#allocation3] sm:$0x1] %vm246_vm2, %v659_v8  ;;  %v568_v40 = vadd.f32 %v529_v39, %v425_v7 }
 0x23c   : > { %578 = vst.msk [vmem:[#allocation2 + $0x8] sm:$0xff] %vm237_vm7, %v569_v38 }
 0x23d   : > { %577 = vst.msk [vmem:[#allocation2] sm:$0xff] %vm237_vm7, %v568_v40  ;;  %v955_v43 = vpop.f32.mrb[2].mxu1 }
 0x23e   : > { %v571_v32 = vadd.f32 %v955_v43, %v428_v41  ;;  %v539_v44 = vpop.f32.mrb[3].mxu1 }
 0x23f   : > { %v570_v45 = vadd.f32 %v539_v44, %v427_v42 }
 0x240   : > { %580 = vst.msk [vmem:[#allocation2 + $0x18] sm:$0xff] %vm237_vm7, %v571_v32 }
 0x241   : > { %579 = vst.msk [vmem:[#allocation2 + $0x10] sm:$0xff] %vm237_vm7, %v570_v45  ;;  %v958_v50 = vpop.f32.mrb[4].mxu1 }
 0x242   : > { %v573_v52 = vadd.f32 %v958_v50, %v430_v46  ;;  %v549_v53 = vpop.f32.mrb[5].mxu1  ;;  %v899_v54 = vld [vmem:[#allocation3] ss:$0 sm:$0xff] }
 0x243   : > { %v572_v55 = vadd.f32 %v549_v53, %v429_v47  ;;  %v666_v57 = vld [vmem:[#allocation2 + $0x8] sm:$0xff]  ;;  %v688_v58 = vmul.f32 %v899_v54, %v673_v48  ;;  %v689_v59 = vmul.f32 %v899_v54, %v674_v49  ;;  %v691_v63 = vmul.f32 %v899_v54, %v676_v51 }
 0x244   : > { %582 = vst.msk [vmem:[#allocation2 + $0x28] sm:$0xff] %vm237_vm7, %v573_v52  ;;  %v665_v61 = vld [vmem:[#allocation2] sm:$0xff]  ;;  %v690_v15 = vmul.f32 %v899_v54, %v675_v62  ;;  %v693_v24 = vmul.f32 %v899_v54, %v678_v12  ;;  %v692_v27 = vmul.f32 %v899_v54, %v677_v19  ;;  %v695_v37 = vmul.f32 %v899_v54, %v680_v26 }
 0x245   : > { %581 = vst.msk [vmem:[#allocation2 + $0x20] sm:$0xff] %vm237_vm7, %v572_v55  ;;  %v961_v0 = vpop.f32.mrb[6].mxu1  ;;  %v696_v1 = vsub.f32 %v665_v61, %v688_v58  ;;  %v697_v4 = vsub.f32 %v666_v57, %v689_v59  ;;  %v694_v5 = vmul.f32 %v899_v54, %v679_v31 }
 0x246   : > { %v575_v6 = vadd.f32 %v961_v0, %v432_v56  ;;  %v559_v9 = vpop.f32.mrb[7].mxu1 }
 0x247   : > { %v574_v10 = vadd.f32 %v559_v9, %v431_v60  ;;  %v668_v11 = vld [vmem:[#allocation2 + $0x18] sm:$0xff]  ;;  %v704_v16 = vmul.f32 %v696_v1, %v696_v1  ;;  %v705_v17 = vmul.f32 %v697_v4, %v697_v4 }
 0x248   : > { %584 = vst.msk [vmem:[#allocation2 + $0x38] sm:$0xff] %vm237_vm7, %v575_v6  ;;  %v667_v18 = vld [vmem:[#allocation2 + $0x10] sm:$0xff]  ;;  %v699_v20 = vsub.f32 %v668_v11, %v691_v63 }
 0x249   : > { %583 = vst.msk [vmem:[#allocation2 + $0x30] sm:$0xff] %vm237_vm7, %v574_v10  ;;  %v698_v21 = vsub.f32 %v667_v18, %v690_v15  ;;  %v712_v22 = vsel %vm237_vm7, %v704_v16, 0.0  ;;  %v713_v23 = vsel %vm237_vm7, %v705_v17, 0.0 }
 0x24a   : > { %v707_v29 = vmul.f32 %v699_v20, %v699_v20  ;;  %v714_v34 = vadd.f32 %v713_v23, %v712_v22 }
 0x24b   : > { %v670_v25 = vld [vmem:[#allocation2 + $0x28] sm:$0xff]  ;;  %v706_v28 = vmul.f32 %v698_v21, %v698_v21 }
 0x24c   : > { %v669_v30 = vld [vmem:[#allocation2 + $0x20] sm:$0xff]  ;;  %v701_v33 = vsub.f32 %v670_v25, %v693_v24  ;;  %v717_v13 = vsel %vm237_vm7, %v707_v29, 0.0 }
 0x24d   : > { %v700_v35 = vsub.f32 %v669_v30, %v692_v27  ;;  %v715_v36 = vsel %vm237_vm7, %v706_v28, 0.0 }
 0x24e   : > { %v716_v2 = vadd.f32 %v715_v36, %v714_v34  ;;  %v709_v8 = vmul.f32 %v701_v33, %v701_v33 }
 0x24f   : > { %v672_v3 = vld [vmem:[#allocation2 + $0x38] sm:$0xff]  ;;  %v708_v7 = vmul.f32 %v700_v35, %v700_v35 }
 0x250   : > { %v671_v14 = vld [vmem:[#allocation2 + $0x30] sm:$0xff]  ;;  %v703_v38 = vsub.f32 %v672_v3, %v695_v37  ;;  %v718_v39 = vadd.f32 %v717_v13, %v716_v2  ;;  %v721_v44 = vsel %vm237_vm7, %v709_v8, 0.0 }
 0x251   : > { %v702_v40 = vsub.f32 %v671_v14, %v694_v5  ;;  %v719_v41 = vsel %vm237_vm7, %v708_v7, 0.0 }
 0x252   : > { %v720_v42 = vadd.f32 %v719_v41, %v718_v39  ;;  %v711_v32 = vmul.f32 %v703_v38, %v703_v38 }
 0x253   : > { %v710_v43 = vmul.f32 %v702_v40, %v702_v40 }
 0x254   : > { %v722_v45 = vadd.f32 %v721_v44, %v720_v42  ;;  %v725_v48 = vsel %vm237_vm7, %v711_v32, 0.0 }
 0x255   : > { %v723_v46 = vsel %vm237_vm7, %v710_v43, 0.0 }
 0x256   : > { %v724_v47 = vadd.f32 %v723_v46, %v722_v45 }
 0x258   : > { %v726_v49 = vadd.f32 %v725_v48, %v724_v47 }
 0x25a   : > { %v727_v50 = vrot.slane %v726_v49, 4 }
 0x25c   : > { %v728_v51 = vadd.f32 %v727_v50, %v726_v49 }
 0x25e   : > { %v729_v52 = vrot.slane %v728_v51, 2 }
 0x260   : > { %v730_v53 = vadd.f32 %v729_v52, %v728_v51 }
 0x262   : > { %v731_v54 = vrot.slane %v730_v53, 1 }
 0x264   : > { %v732_v55 = vadd.f32 %v731_v54, %v730_v53 }
 0x266   : > { %v733_v56 = vmax.f32 %v732_v55, 1e-24 }
 0x268   : > { %1072 = vrsqrt.f32 %v733_v56 }
 0x272   : > { %v1073_v57 = vpop.eup %1072 }
 0x273   : > { %v735_v58 = vmul.f32 %v1073_v57, %v696_v1  ;;  %v736_v59 = vmul.f32 %v1073_v57, %v697_v4  ;;  %v737_v60 = vmul.f32 %v1073_v57, %v698_v21  ;;  %v738_v61 = vmul.f32 %v1073_v57, %v699_v20 }
 0x274   : > { %v739_v62 = vmul.f32 %v1073_v57, %v700_v35  ;;  %v740_v9 = vmul.f32 %v1073_v57, %v701_v33  ;;  %v741_v16 = vmul.f32 %v1073_v57, %v702_v40  ;;  %v742_v1 = vmul.f32 %v1073_v57, %v703_v38 }
 0x275   : > { %v743_v63 = vmul.f32 %v735_v58, %v735_v58  ;;  %v744_v0 = vmul.f32 %v736_v59, %v736_v59  ;;  %v745_v6 = vmul.f32 %v737_v60, %v737_v60  ;;  %v746_v10 = vmul.f32 %v738_v61, %v738_v61 }
 0x276   : > { %v747_v17 = vmul.f32 %v739_v62, %v739_v62  ;;  %v748_v4 = vmul.f32 %v740_v9, %v740_v9  ;;  %v749_v22 = vmul.f32 %v741_v16, %v741_v16  ;;  %v750_v25 = vmul.f32 %v742_v1, %v742_v1 }
 0x277   : > { %v751_v11 = vsel %vm237_vm7, %v743_v63, 0.0  ;;  %v752_v12 = vsel %vm237_vm7, %v744_v0, 0.0  ;;  %v754_v18 = vsel %vm237_vm7, %v745_v6, 0.0  ;;  %v756_v20 = vsel %vm237_vm7, %v746_v10, 0.0 }
 0x278   : > { %v753_v15 = vadd.f32 %v752_v12, %v751_v11  ;;  %v758_v23 = vsel %vm237_vm7, %v747_v17, 0.0  ;;  %v760_v26 = vsel %vm237_vm7, %v748_v4, 0.0  ;;  %v762_v28 = vsel %vm237_vm7, %v749_v22, 0.0 }
 0x279   : > { %v764_v30 = vsel %vm237_vm7, %v750_v25, 0.0 }
 0x27a   : > { %v755_v19 = vadd.f32 %v754_v18, %v753_v15 }
 0x27c   : > { %v757_v21 = vadd.f32 %v756_v20, %v755_v19 }
 0x27e   : > { %v759_v24 = vadd.f32 %v758_v23, %v757_v21 }
 0x280   : > { %v761_v27 = vadd.f32 %v760_v26, %v759_v24 }
 0x282   : > { %v763_v29 = vadd.f32 %v762_v28, %v761_v27 }
 0x284   : > { %v765_v31 = vadd.f32 %v764_v30, %v763_v29 }
 0x286   : > { %766 = vadd.xlane.f32.xlu1 %v765_v31 }
 0x313   : > { %v767_v33 = vpop.xlane.xlu1 %766 }
 0x314   : > { %v768_v34 = vrot.slane %v767_v33, 4 }
 0x316   : > { %v769_v35 = vadd.f32 %v768_v34, %v767_v33 }
 0x318   : > { %v770_v36 = vrot.slane %v769_v35, 2 }
 0x31a   : > { %v771_v37 = vadd.f32 %v770_v36, %v769_v35 }
 0x31c   : > { %v772_v2 = vrot.slane %v771_v37, 1 }
 0x31e   : > { %v773_v3 = vadd.f32 %v772_v2, %v771_v37 }
 0x320   : > { %995 = vpush %v773_v3 }
 0x351   : > { %s996_s14 = spop %995 }
 0x352   : > { %s775_s21 = smax.f32 %s1165_s15, %s996_s14 }
 0x353   : > { %v776_v5 = vstv %s775_s21 }
 0x354   : > { %1074 = vrsqrt.f32 %v776_v5 }
 0x35e   : > { %v1075_v7 = vpop.eup %1074 }
 0x35f   : > { %997 = vpush %v1075_v7 }
 0x390   : > { %s998_s24 = spop %997 }
 0x391   : > { %v779_v8 = vstv %s998_s24 }
 0x392   : > { %v780_v13 = vmul.f32 %v779_v8, %v735_v58  ;;  %v781_v14 = vmul.f32 %v779_v8, %v736_v59  ;;  %v782_v38 = vmul.f32 %v779_v8, %v737_v60  ;;  %v783_v39 = vmul.f32 %v779_v8, %v738_v61 }
 0x393   : > { %v784_v40 = vmul.f32 %v779_v8, %v739_v62  ;;  %v785_v41 = vmul.f32 %v779_v8, %v740_v9  ;;  %v786_v42 = vmul.f32 %v779_v8, %v741_v16  ;;  %v787_v43 = vmul.f32 %v779_v8, %v742_v1 }
 0x394   : > { %788 = vst.msk [vmem:[%s232_s29] sm:$0xff] %vm237_vm7, %v780_v13  ;;  %789 = vst.msk [vmem:[%s232_s29 + $0x8] sm:$0xff] %vm237_vm7, %v781_v14 }
 0x395   : > { %790 = vst.msk [vmem:[%s232_s29 + $0x10] sm:$0xff] %vm237_vm7, %v782_v38  ;;  %791 = vst.msk [vmem:[%s232_s29 + $0x18] sm:$0xff] %vm237_vm7, %v783_v39 }
 0x396   : > { %792 = vst.msk [vmem:[%s232_s29 + $0x20] sm:$0xff] %vm237_vm7, %v784_v40  ;;  %793 = vst.msk [vmem:[%s232_s29 + $0x28] sm:$0xff] %vm237_vm7, %v785_v41 }
 0x397   : > { %794 = vst.msk [vmem:[%s232_s29 + $0x30] sm:$0xff] %vm237_vm7, %v786_v42  ;;  %795 = vst.msk [vmem:[%s232_s29 + $0x38] sm:$0xff] %vm237_vm7, %v787_v43 }
 0x398 PF: > { %s17_s20 = sadd.s32 1, %s1156_s20   ;;  %s1478_s15 = smov %s1140_s16 }
 0x399   : > { %p14_p9 = scmp.ge.s32.totalorder %s17_s20, 4   ;;  %s1479_s16 = smov %s1144_s17 }
 0x39a   : > { %s1480_s17 = smov %s1240_s27  ;;  %s1481_s18 = smov %s1152_s19 }
 0x39b   : > { %s1482_s19 = smov %s1484_s22  ;;  %16 = sbr.rel (!%p14_p9) target bundleno = 4 (0x4), region = 84 }
 0x3a2   :  { %817 = vsyncpa [#allocation5], 1 }
 0x3a3   :  { %819 = vsyncpa [#allocation5 + $0x1], 1 }

</bundles_post_ra>
